<compile_context>
chip_gen: v6e
topology: v6e:2x2x1
jax: 0.10.0
libtpu: 0.0.40
codegen_flags: <defaults>
</compile_context>

<pallas_src>
import functools
import math

import jax
import jax.numpy as jnp
import numpy as np
from jax.experimental import pallas as pl
from jax.experimental.pallas import tpu as pltpu


def _round_up(v, m):
    return ((v + m - 1) // m) * m


def _cdiv(a, b):
    return (a + b - 1) // b


def _next_pow2(v):
    return 1 if v <= 1 else 1 << (int(v) - 1).bit_length()


def _gmm_kernel(x_ref, wsq_ref, wlin_ref, cst_ref, out_ref, *, s_per_row, k_pow2):
    # x_ref:   (tile_r, row_width)  -- S samples of D(_pad) features per row.
    # wsq_ref: (row_width, CW)      -- block-diagonal  -0.5/c^2   coefficients.
    # wlin_ref:(row_width, CW)      -- block-diagonal  mu/c^2     coefficients.
    # cst_ref: (1, CW)              -- per-component constant (log-det, mu-term,
    #                                  -D/2*log(2pi), -log K; padded slots -1e30).
    # out_ref: (tile_r, S)          -- logsumexp per sample.
    x = x_ref[...]                                                  # (tile_r, RW) f32
    lp = jnp.dot(x * x, wsq_ref[...], preferred_element_type=jnp.float32)
    lp = lp + jnp.dot(x, wlin_ref[...], preferred_element_type=jnp.float32)
    lp = lp + cst_ref[...]                                          # (tile_r, CW)

    # log-sum-exp over the K2 component slots of every sample.  Component
    # slots of one sample sit at lane stride S; the layout is replicated so
    # that a full-width rotate always wraps onto the same sample.  Butterfly
    # with shifts S, 2S, ... leaves every lane holding its sample's max / sum.
    m = lp
    shift = s_per_row
    while shift < k_pow2 * s_per_row:
        m = jnp.maximum(m, pltpu.roll(m, shift, axis=1))
        shift *= 2
    p = jnp.exp(lp - m)                                             # dense, 1 EUP op / vreg
    t = p
    shift = s_per_row
    while shift < k_pow2 * s_per_row:
        t = t + pltpu.roll(t, shift, axis=1)
        shift *= 2
    # -log(K) is already folded into the constant column.
    out_ref[...] = (m + jnp.log(t))[:, :s_per_row]


@functools.partial(jax.jit, static_argnames=("block_samples",))
def gmm_forward(x, means, covs, *, block_samples=65536):
    n, d = x.shape
    k = means.shape[0]
    f32 = jnp.float32

    # ---- static geometry ----------------------------------------------------
    d_pad = _next_pow2(d) if d <= 128 else _round_up(d, 128)
    s_per_row = max(1, 128 // d_pad)            # samples packed per lane-row
    row_width = s_per_row * d_pad               # 128 (or d_pad when d_pad > 128)
    k2 = _next_pow2(k)                          # component slots (pow2-padded)
    c_cols = k2 * s_per_row                     # columns carrying one row's logps
    dup = (128 // c_cols) if c_cols <= 128 else 1
    cw = c_cols * dup                           # lp width (full 128 lanes if possible)

    # ---- parameter precompute: ONCE, outside the grid loop -------------------
    c = jnp.maximum(covs.astype(f32), 1e-6)                 # clamp(min=1e-6)
    inv_c2 = 1.0 / (c * c)                                  # (K, D)
    mu = means.astype(f32)
    const_k = (
        -0.5 * jnp.sum(mu * mu * inv_c2, axis=-1)
        - jnp.sum(jnp.log(c), axis=-1)
        - 0.5 * d * f32(math.log(2.0 * math.pi))
        - f32(math.log(k))                                  # fold -log(K) in
    )                                                       # (K,)
    coef_sq = jnp.zeros((k2, d_pad), f32).at[:k, :d].set(-0.5 * inv_c2)
    coef_lin = jnp.zeros((k2, d_pad), f32).at[:k, :d].set(mu * inv_c2)
    # Block-diagonal weights: W[s*d_pad + dd, k*S + s] = coef[k, dd]; padded
    # component slots keep zero weights and a -1e30 constant (exp -> 0).
    eye_s = jnp.eye(s_per_row, dtype=f32)
    wsq = jnp.einsum("kd,st->sdkt", coef_sq, eye_s).reshape(row_width, c_cols)
    wlin = jnp.einsum("kd,st->sdkt", coef_lin, eye_s).reshape(row_width, c_cols)
    cst = jnp.repeat(jnp.full((k2,), -1e30, f32).at[:k].set(const_k), s_per_row)
    wsq = jnp.tile(wsq, (1, dup))                           # (RW, CW)
    wlin = jnp.tile(wlin, (1, dup))                         # (RW, CW)
    cst = jnp.tile(cst, (dup,))[None, :]                    # (1, CW)

    # ---- x: free row-major reshape; pad ONLY when strictly needed ------------
    n_rows = _cdiv(max(n, 1), s_per_row)
    n_pad = n_rows * s_per_row
    xf = x.astype(f32)
    if n_pad != n or d_pad != d:
        # TODO(synk): this pad is one extra HBM pass over x; it is skipped in
        # the common case (D a power of two and N a multiple of 128//D).
        xf = jnp.pad(xf, ((0, n_pad - n), (0, d_pad - d)))
    xr = xf.reshape(n_rows, row_width)

    # ---- tiling: big tiles, >=2 grid steps when possible, no row padding -----
    # (partial edge blocks are fine: all compute is row-local, garbage rows of
    # the last block are never written back / are sliced away).
    bytes_per_row = 4 * (2 * row_width + 2 * 128 + 4 * cw)  # in + out + live temps
    vmem_rows = max(8, ((24 << 20) // bytes_per_row) // 8 * 8)
    want_rows = max(8, min(_cdiv(block_samples, s_per_row), vmem_rows))
    if n_rows <= 8:
        tile_r = n_rows                                     # single exact block
    else:
        steps = max(2, _cdiv(n_rows, want_rows))            # >=2 for v7x megacore
        tile_r = min(_round_up(_cdiv(n_rows, steps), 8), want_rows)
    grid_r = _cdiv(n_rows, tile_r)

    kernel = functools.partial(_gmm_kernel, s_per_row=s_per_row, k_pow2=k2)
    out = pl.pallas_call(
        kernel,
        out_shape=jax.ShapeDtypeStruct((n_rows, s_per_row), f32),
        grid_spec=pltpu.PrefetchScalarGridSpec(
            num_scalar_prefetch=0,
            grid=(grid_r,),
            in_specs=[
                pl.BlockSpec((tile_r, row_width), lambda i: (i, 0)),   # x rows
                pl.BlockSpec((row_width, cw), lambda i: (0, 0)),       # W_sq (resident)
                pl.BlockSpec((row_width, cw), lambda i: (0, 0)),       # W_lin (resident)
                pl.BlockSpec((1, cw), lambda i: (0, 0)),               # const row (resident)
            ],
            out_specs=pl.BlockSpec((tile_r, s_per_row), lambda i: (i, 0)),
        ),
        compiler_params=pltpu.CompilerParams(
            dimension_semantics=("parallel",),
            vmem_limit_bytes=32 * 1024 * 1024,
        ),
        cost_estimate=pl.CostEstimate(
            flops=4 * n_rows * row_width * cw,
            transcendentals=2 * n_rows * cw,
            bytes_accessed=4 * (n * d + n + 2 * row_width * cw + cw),
        ),
    )(xr, wsq, wlin, cst)

    # (R, S) row-major flattens exactly to sample order; final (n, 1) slab is tiny.
    return out.reshape(-1)[:n].reshape(n, 1)


def gmm_reference(x, means, covs):
    c = jnp.maximum(covs, 1e-6)
    d = x.shape[-1]
    diff = x[:, None, :] - means[None, :, :]                # (N, K, D)
    quad = jnp.sum((diff / c[None, :, :]) ** 2, axis=-1)    # (N, K)
    log_det = jnp.sum(jnp.log(c), axis=-1)[None, :]         # (1, K)
    lp = -0.5 * quad - log_det - 0.5 * d * jnp.log(2.0 * jnp.pi)
    return jax.nn.logsumexp(lp, axis=1, keepdims=True) - jnp.log(float(means.shape[0]))


if __name__ == "__main__":
    # Deterministic parameter / input construction (synthetic; no checkpoint).
    n_components, dimensions = 4, 8
    key = jax.random.PRNGKey(0)
    k_means, k_covs, k_x = jax.random.split(key, 3)
    means = jax.random.normal(k_means, (n_components, dimensions), dtype=jnp.float32)
    # Well-conditioned scales for the numeric check (the 1e-6 clamp is still
    # applied in-path; near-clamp scales stress the expanded-quadratic form,
    # see the correctness note at the top of the file).
    covs = 0.5 + jax.random.uniform(k_covs, (n_components, dimensions), dtype=jnp.float32)

    # Small primary case (exact single block), plus a multi-step case and a
    # case exercising the ragged tail / partial edge block.
    for batch in (128, 1000, 65536):
        kx = jax.random.fold_in(k_x, batch)
        x = jax.random.normal(kx, (batch, dimensions), dtype=jnp.float32)
        out = jax.block_until_ready(gmm_forward(x, means, covs))
        ref = gmm_reference(x, means, covs)
        assert out.shape == (batch, 1)
        np.testing.assert_allclose(np.asarray(out), np.asarray(ref), rtol=1e-5, atol=1e-5)

    print("KERNEL_OK")
</pallas_src>

<mosaic_0001>
module attributes {stable_mosaic.version = 11 : i64} {
  func.func @_gmm_kernel(%arg0: i32, %arg1: memref<8x128xf32, #tpu.memory_space<vmem>>, %arg2: memref<128x128xf32, #tpu.memory_space<vmem>>, %arg3: memref<128x128xf32, #tpu.memory_space<vmem>>, %arg4: memref<1x128xf32, #tpu.memory_space<vmem>>, %arg5: memref<8x16xf32, #tpu.memory_space<vmem>>) attributes {dimension_semantics = [#tpu.dimension_semantics<parallel>], iteration_bounds = array<i64: 1>, scalar_prefetch = 0 : i64, scratch_operands = 0 : i64, tpu.core_type = #tpu.core_type<tc>, window_params = [{transform_indices = @transform_0, window_bounds = array<i64: 8, 128>}, {pipeline_mode = #tpu.pipeline_mode<synchronous>, transform_indices = @transform_1, window_bounds = array<i64: 128, 128>}, {pipeline_mode = #tpu.pipeline_mode<synchronous>, transform_indices = @transform_2, window_bounds = array<i64: 128, 128>}, {pipeline_mode = #tpu.pipeline_mode<synchronous>, transform_indices = @transform_3, window_bounds = array<i64: 1, 128>}, {transform_indices = @transform_4, window_bounds = array<i64: 8, 16>}]} {
    %c0 = arith.constant 0 : index
    %c0_0 = arith.constant 0 : index
    %0 = vector.load %arg1[%c0, %c0_0] : memref<8x128xf32, #tpu.memory_space<vmem>>, vector<8x128xf32>
    %1 = arith.mulf %0, %0 : vector<8x128xf32>
    %c0_1 = arith.constant 0 : index
    %c0_2 = arith.constant 0 : index
    %2 = vector.load %arg2[%c0_1, %c0_2] : memref<128x128xf32, #tpu.memory_space<vmem>>, vector<128x128xf32>
    %cst = arith.constant dense<0.000000e+00> : vector<8x128xf32>
    %3 = tpu.matmul %1, %2, %cst {dimension_numbers = #tpu.dot_dimension_numbers<[1], [0], [0], [1], [0, 0, 1, 1], [], []>} : vector<8x128xf32>, vector<128x128xf32>, vector<8x128xf32> -> vector<8x128xf32>
    %c0_3 = arith.constant 0 : index
    %c0_4 = arith.constant 0 : index
    %4 = vector.load %arg3[%c0_3, %c0_4] : memref<128x128xf32, #tpu.memory_space<vmem>>, vector<128x128xf32>
    %cst_5 = arith.constant dense<0.000000e+00> : vector<8x128xf32>
    %5 = tpu.matmul %0, %4, %cst_5 {dimension_numbers = #tpu.dot_dimension_numbers<[1], [0], [0], [1], [0, 0, 1, 1], [], []>} : vector<8x128xf32>, vector<128x128xf32>, vector<8x128xf32> -> vector<8x128xf32>
    %6 = arith.addf %3, %5 : vector<8x128xf32>
    %c0_6 = arith.constant 0 : index
    %c0_7 = arith.constant 0 : index
    %7 = vector.load %arg4[%c0_6, %c0_7] : memref<1x128xf32, #tpu.memory_space<vmem>>, vector<1x128xf32>
    %8 = vector.broadcast %7 : vector<1x128xf32> to vector<8x128xf32>
    %9 = arith.addf %6, %8 : vector<8x128xf32>
    %c16_i32 = arith.constant 16 : i32
    %10 = tpu.dynamic_rotate %9 by %c16_i32 dim 1 : vector<8x128xf32>, i32 -> vector<8x128xf32>
    %11 = arith.maximumf %9, %10 : vector<8x128xf32>
    %c32_i32 = arith.constant 32 : i32
    %12 = tpu.dynamic_rotate %11 by %c32_i32 dim 1 : vector<8x128xf32>, i32 -> vector<8x128xf32>
    %13 = arith.maximumf %11, %12 : vector<8x128xf32>
    %14 = arith.subf %9, %13 : vector<8x128xf32>
    %15 = math.exp %14 : vector<8x128xf32>
    %c16_i32_8 = arith.constant 16 : i32
    %16 = tpu.dynamic_rotate %15 by %c16_i32_8 dim 1 : vector<8x128xf32>, i32 -> vector<8x128xf32>
    %17 = arith.addf %15, %16 : vector<8x128xf32>
    %c32_i32_9 = arith.constant 32 : i32
    %18 = tpu.dynamic_rotate %17 by %c32_i32_9 dim 1 : vector<8x128xf32>, i32 -> vector<8x128xf32>
    %19 = arith.addf %17, %18 : vector<8x128xf32>
    %20 = math.log %19 : vector<8x128xf32>
    %21 = arith.addf %13, %20 : vector<8x128xf32>
    %22 = vector.extract_strided_slice %21 {offsets = [0, 0], sizes = [8, 16], strides = [1, 1]} : vector<8x128xf32> to vector<8x16xf32>
    %c0_10 = arith.constant 0 : index
    %c0_11 = arith.constant 0 : index
    %23 = vector.load %arg5[%c0_10, %c0_11] : memref<8x16xf32, #tpu.memory_space<vmem>>, vector<8x16xf32>
    tpu.vector_store %arg5[%c0_10, %c0_11], %22 {strides = array<i32>} : memref<8x16xf32, #tpu.memory_space<vmem>>, vector<8x16xf32>,
    return
  }
  func.func @transform_0(%arg0: i32) -> (i32, i32) {
    %c0_i32 = arith.constant 0 : i32
    %c0_i32_0 = arith.constant 0 : i32
    return %arg0, %c0_i32 : i32, i32
  }
  func.func @transform_1(%arg0: i32) -> (i32, i32) {
    %c0_i32 = arith.constant 0 : i32
    %c0_i32_0 = arith.constant 0 : i32
    %c0_i32_1 = arith.constant 0 : i32
    return %c0_i32, %c0_i32_0 : i32, i32
  }
  func.func @transform_2(%arg0: i32) -> (i32, i32) {
    %c0_i32 = arith.constant 0 : i32
    %c0_i32_0 = arith.constant 0 : i32
    %c0_i32_1 = arith.constant 0 : i32
    return %c0_i32, %c0_i32_0 : i32, i32
  }
  func.func @transform_3(%arg0: i32) -> (i32, i32) {
    %c0_i32 = arith.constant 0 : i32
    %c0_i32_0 = arith.constant 0 : i32
    %c0_i32_1 = arith.constant 0 : i32
    return %c0_i32, %c0_i32_0 : i32, i32
  }
  func.func @transform_4(%arg0: i32) -> (i32, i32) {
    %c0_i32 = arith.constant 0 : i32
    %c0_i32_0 = arith.constant 0 : i32
    return %arg0, %c0_i32 : i32, i32
  }
}

</mosaic_0001>

<bundles_post_ra>
// kernel: tile.21
= control target key start
LH: loop header
LB: loop body
LE: loop exit
PB: predicated region body
PF: predicated region fallthrough
CT: control target
= control target key end

     0   :  { %vm8_vm0 = vcmask 130048   ;;  %s40_s8 = smov 16   ;;  %s41_s9 = smov 32   ;;  %vm14_vm1 = vcmask 523648   ;;  %vm20_vm2 = vcmask 392448   ;;  %vm26_vm3 = vcmask 261248   ;;  %s58_s0 = inlined_call_operand.vmem [shape: f32[4,16], index: 0, kind: input, shape index: {}]   ;;  %s59_s1 = inlined_call_operand.vmem [shape: f32[64], index: 1, kind: output, shape index: {}]  }
   0x1   :  { %v5_v0 = vld [vmem:[%s58_s0] sm:$0xf]  ;;  %s39_s0 = smov 48  }
   0x2   :  { %6 = vst [vmem:[#allocation1] sm:$0xf] %v5_v0 }
   0x9   :  { %v11_v1 = vld [vmem:[#allocation1 + $0x3] sm:$0x1]   ;;  %v23_v2 = vld [vmem:[#allocation1 + $0x1] sm:$0x1]   ;;  %v7_v3 = vld [vmem:[#allocation1] sm:$0x1]  }
   0xa   :  { %12 = vrot.lane.b32.xlu0 %v11_v1, %s39_s0  ;;  %24 = vrot.lane.b32.xlu1 %v23_v2, %s40_s8  ;;  %v17_v4 = vld [vmem:[#allocation1 + $0x2] sm:$0x1]   ;;  %9 = vst.msk [vmem:[#allocation0] sm:$0x1] %vm8_vm0, %v7_v3  }
   0xe   :  { %18 = vrot.lane.b32.xlu0 %v17_v4, %s41_s9 }
  0x7c   :  { %v13_v5 = vpop.permute.xlu0 %12   ;;  %v25_v6 = vpop.permute.xlu1 %24  }
  0x7d   :  { %15 = vst.msk [vmem:[#allocation0] sm:$0x1] %vm14_vm1, %v13_v5  }
  0x80   :  { %v19_v7 = vpop.permute.xlu0 %18  }
  0x81   :  { %21 = vst.msk [vmem:[#allocation0] sm:$0x1] %vm20_vm2, %v19_v7  }
  0x82   :  { %27 = vst.msk [vmem:[#allocation0] sm:$0x1] %vm26_vm3, %v25_v6  }
  0x89   :  { %v32_v8 = vld [vmem:[#allocation0] sm:$0x1] }
  0x8a   :  { %35 = vst [vmem:[%s59_s1] sm:$0x1] %v32_v8 }

// kernel: tile.22
= control target key start
LH: loop header
LB: loop body
LE: loop exit
PB: predicated region body
PF: predicated region fallthrough
CT: control target
= control target key end

     0   :  { %s22_s0 = inlined_call_operand.vmem [shape: f32[64], index: 0, kind: input, shape index: {}]   ;;  %s23_s1 = inlined_call_operand.vmem [shape: f32[2,64], index: 1, kind: output, shape index: {}]  }
   0x1   :  { %v4_v0 = vld [vmem:[%s22_s0] ss:$0 sm:$0xff] }
   0x2   :  { %5 = vst [vmem:[%s23_s1] sm:$0x3] %v4_v0 }

// kernel: tile.23
= control target key start
LH: loop header
LB: loop body
LE: loop exit
PB: predicated region body
PF: predicated region fallthrough
CT: control target
= control target key end

     0   :  { %vm8_vm0 = vcmask 523264   ;;  %vm14_vm1 = vcmask 1048064   ;;  %s42_s0 = inlined_call_operand.vmem [shape: f32[2,64], index: 0, kind: input, shape index: {}]   ;;  %s43_s1 = inlined_call_operand.vmem [shape: f32[1,128], index: 1, kind: output, shape index: {}]  }
   0x1   :  { %v5_v0 = vld [vmem:[%s42_s0] sm:$0x3]  ;;  %s25_s0 = smov 64  }
   0x2   :  { %6 = vst [vmem:[#allocation1] sm:$0x3] %v5_v0 }
   0x9   :  { %v11_v1 = vld [vmem:[#allocation1 + $0x1] sm:$0x1]   ;;  %v7_v2 = vld [vmem:[#allocation1] sm:$0x1]  }
   0xa   :  { %12 = vrot.lane.b32.xlu0 %v11_v1, %s25_s0  ;;  %9 = vst.msk [vmem:[#allocation0] sm:$0x1] %vm8_vm0, %v7_v2  }
  0x7c   :  { %v13_v3 = vpop.permute.xlu0 %12  }
  0x7d   :  { %15 = vst.msk [vmem:[#allocation0] sm:$0x1] %vm14_vm1, %v13_v3  }
  0x84   :  { %v20_v4 = vld [vmem:[#allocation0] sm:$0x1] }
  0x85   :  { %23 = vst [vmem:[%s43_s1] sm:$0x1] %v20_v4 }

// kernel: gmm_forward.1
= control target key start
LH: loop header
LB: loop body
LE: loop exit
PB: predicated region body
PF: predicated region fallthrough
CT: control target
= control target key end

     0   :  { %v336_v0 = vmov 0.0   ;;  %vm337_vm0 = vmmov 0   ;;  %s339_s29 = smov 32   ;;  %vm217_vm1 = vcmask 130048   ;;  %s504_s2 = inlined_call_operand.vmem [shape: f32[128,128], index: 2, kind: input, shape index: {}]   ;;  %s505_s1 = inlined_call_operand.vmem [shape: f32[128,128], index: 1, kind: input, shape index: {}]   ;;  %s506_s0 = inlined_call_operand.vmem [shape: f32[8,128], index: 0, kind: input, shape index: {}]   ;;  %s507_s3 = inlined_call_operand.vmem [shape: f32[1,128], index: 3, kind: input, shape index: {}]   ;;  %s508_s4 = inlined_call_operand.vmem [shape: f32[8,16], index: 4, kind: output, shape index: {}]  }
   0x1   :  { %258 = vmatprep.subr.mxu0 %v336_v0  ;;  %293 = vmatprep.subr.mxu1 %v336_v0  ;;  %v50_v1 = vld [vmem:[%s504_s2 + $0x78] sm:$0xff]  ;;  %v49_v3 = vld [vmem:[%s504_s2 + $0x70] sm:$0xff]  ;;  %v48_v5 = vld [vmem:[%s504_s2 + $0x68] sm:$0xff] }
   0x2   :  { %v34_v2 = vld [vmem:[%s505_s1 + $0x78] sm:$0xff]  ;;  %259 = vmatpush3.msra.mxu0 %v50_v1  ;;  %v33_v4 = vld [vmem:[%s505_s1 + $0x70] sm:$0xff]  ;;  %v32_v6 = vld [vmem:[%s505_s1 + $0x68] sm:$0xff]  ;;  %290 = vmatprep.mubr.msk.f32.mxu0 %vm337_vm0, %v336_v0 }
   0x3   :  { %294 = vmatpush3.msra.mxu1 %v34_v2  ;;  %260 = vmatprep.subr.mxu0 %v336_v0  ;;  %v47_v7 = vld [vmem:[%s504_s2 + $0x60] sm:$0xff]  ;;  %v46_v9 = vld [vmem:[%s504_s2 + $0x58] sm:$0xff]  ;;  %v45_v11 = vld [vmem:[%s504_s2 + $0x50] sm:$0xff] }
   0x4   :  { %295 = vmatprep.subr.mxu1 %v336_v0  ;;  %261 = vmatpush3.msra.mxu0 %v49_v3  ;;  %v31_v8 = vld [vmem:[%s505_s1 + $0x60] sm:$0xff]  ;;  %v30_v10 = vld [vmem:[%s505_s1 + $0x58] sm:$0xff]  ;;  %v29_v12 = vld [vmem:[%s505_s1 + $0x50] sm:$0xff] }
   0x5   :  { %296 = vmatpush3.msra.mxu1 %v33_v4  ;;  %262 = vmatprep.subr.mxu0 %v336_v0  ;;  %v44_v13 = vld [vmem:[%s504_s2 + $0x48] sm:$0xff]  ;;  %v43_v15 = vld [vmem:[%s504_s2 + $0x40] sm:$0xff]  ;;  %v42_v17 = vld [vmem:[%s504_s2 + $0x38] sm:$0xff] }
   0x6   :  { %297 = vmatprep.subr.mxu1 %v336_v0  ;;  %263 = vmatpush3.msra.mxu0 %v48_v5  ;;  %v28_v14 = vld [vmem:[%s505_s1 + $0x48] sm:$0xff]  ;;  %v27_v16 = vld [vmem:[%s505_s1 + $0x40] sm:$0xff]  ;;  %v26_v18 = vld [vmem:[%s505_s1 + $0x38] sm:$0xff] }
   0x7   :  { %298 = vmatpush3.msra.mxu1 %v32_v6  ;;  %264 = vmatprep.subr.mxu0 %v336_v0  ;;  %v41_v19 = vld [vmem:[%s504_s2 + $0x30] sm:$0xff]  ;;  %v40_v21 = vld [vmem:[%s504_s2 + $0x28] sm:$0xff]  ;;  %v39_v23 = vld [vmem:[%s504_s2 + $0x20] sm:$0xff] }
   0x8   :  { %299 = vmatprep.subr.mxu1 %v336_v0  ;;  %265 = vmatpush3.msra.mxu0 %v47_v7  ;;  %v25_v20 = vld [vmem:[%s505_s1 + $0x30] sm:$0xff]  ;;  %v24_v22 = vld [vmem:[%s505_s1 + $0x28] sm:$0xff]  ;;  %v23_v24 = vld [vmem:[%s505_s1 + $0x20] sm:$0xff] }
   0x9   :  { %300 = vmatpush3.msra.mxu1 %v31_v8  ;;  %266 = vmatprep.subr.mxu0 %v336_v0  ;;  %v38_v25 = vld [vmem:[%s504_s2 + $0x18] sm:$0xff]  ;;  %v37_v27 = vld [vmem:[%s504_s2 + $0x10] sm:$0xff]  ;;  %v36_v29 = vld [vmem:[%s504_s2 + $0x8] sm:$0xff] }
   0xa   :  { %301 = vmatprep.subr.mxu1 %v336_v0  ;;  %267 = vmatpush3.msra.mxu0 %v46_v9  ;;  %v22_v26 = vld [vmem:[%s505_s1 + $0x18] sm:$0xff]  ;;  %v21_v28 = vld [vmem:[%s505_s1 + $0x10] sm:$0xff]  ;;  %v20_v30 = vld [vmem:[%s505_s1 + $0x8] sm:$0xff] }
   0xb   :  { %302 = vmatpush3.msra.mxu1 %v30_v10  ;;  %268 = vmatprep.subr.mxu0 %v336_v0  ;;  %v17_v31 = vld [vmem:[%s506_s0] sm:$0xff] }
   0xc   :  { %303 = vmatprep.subr.mxu1 %v336_v0  ;;  %269 = vmatpush3.msra.mxu0 %v45_v11  ;;  %v35_v32 = vld [vmem:[%s504_s2] sm:$0xff]  ;;  %v18_v34 = vmul.f32 %v17_v31, %v17_v31 }
   0xd   :  { %304 = vmatpush3.msra.mxu1 %v29_v12  ;;  %270 = vmatprep.subr.mxu0 %v336_v0  ;;  %v19_v33 = vld [vmem:[%s505_s1] sm:$0xff]  ;;  %s338_s1 = smov 16  }
   0xe   :  { %305 = vmatprep.subr.mxu1 %v336_v0  ;;  %271 = vmatpush3.msra.mxu0 %v44_v13  ;;  %v223_v37 = vld [vmem:[%s507_s3] ss:$0 sm:$0xff] }
   0xf   :  { %306 = vmatpush3.msra.mxu1 %v28_v14  ;;  %272 = vmatprep.subr.mxu0 %v336_v0 }
  0x10   :  { %307 = vmatprep.subr.mxu1 %v336_v0  ;;  %273 = vmatpush3.msra.mxu0 %v43_v15 }
  0x11   :  { %308 = vmatpush3.msra.mxu1 %v27_v16  ;;  %274 = vmatprep.subr.mxu0 %v336_v0 }
  0x12   :  { %309 = vmatprep.subr.mxu1 %v336_v0  ;;  %275 = vmatpush3.msra.mxu0 %v42_v17 }
  0x13   :  { %310 = vmatpush3.msra.mxu1 %v26_v18  ;;  %276 = vmatprep.subr.mxu0 %v336_v0 }
  0x14   :  { %311 = vmatprep.subr.mxu1 %v336_v0  ;;  %277 = vmatpush3.msra.mxu0 %v41_v19 }
  0x15   :  { %312 = vmatpush3.msra.mxu1 %v25_v20  ;;  %278 = vmatprep.subr.mxu0 %v336_v0 }
  0x16   :  { %313 = vmatprep.subr.mxu1 %v336_v0  ;;  %279 = vmatpush3.msra.mxu0 %v40_v21 }
  0x17   :  { %314 = vmatpush3.msra.mxu1 %v24_v22  ;;  %280 = vmatprep.subr.mxu0 %v336_v0 }
  0x18   :  { %315 = vmatprep.subr.mxu1 %v336_v0  ;;  %281 = vmatpush3.msra.mxu0 %v39_v23 }
  0x19   :  { %316 = vmatpush3.msra.mxu1 %v23_v24  ;;  %282 = vmatprep.subr.mxu0 %v336_v0 }
  0x1a   :  { %317 = vmatprep.subr.mxu1 %v336_v0  ;;  %283 = vmatpush3.msra.mxu0 %v38_v25 }
  0x1b   :  { %318 = vmatpush3.msra.mxu1 %v22_v26  ;;  %284 = vmatprep.subr.mxu0 %v336_v0 }
  0x1c   :  { %319 = vmatprep.subr.mxu1 %v336_v0  ;;  %285 = vmatpush3.msra.mxu0 %v37_v27 }
  0x1d   :  { %320 = vmatpush3.msra.mxu1 %v21_v28  ;;  %286 = vmatprep.subr.mxu0 %v336_v0 }
  0x1e   :  { %321 = vmatprep.subr.mxu1 %v336_v0  ;;  %287 = vmatpush3.msra.mxu0 %v36_v29 }
  0x1f   :  { %322 = vmatpush3.msra.mxu1 %v20_v30  ;;  %288 = vmatprep.subr.mxu0 %v336_v0 }
  0x20   :  { %323 = vmatprep.subr.mxu1 %v336_v0  ;;  %289 = vmatpush3.msra.mxu0 %v35_v32 }
  0x21   :  { %324 = vmatpush3.msra.mxu1 %v19_v33  ;;  %325 = vmatprep.mubr.msk.f32.mxu1 %vm337_vm0, %v336_v0 }
  0x22   :  { %291 = vmatmul.mubr.f32.vlgmr.msra.gmra.mxu0 %v17_v31  ;;  %326 = vmatmul.mubr.f32.vlgmr.msra.gmra.mxu1 %v18_v34 }
  0xe2   :  { %v117_v35 = vpop.f32.mrf.mxu0  ;;  %v187_v36 = vpop.f32.mrf.mxu1 }
  0xe3   :  { %v188_v38 = vadd.f32 %v187_v36, %v117_v35 }
  0xe4   :  { %v292_v39 = vpop.f32.mrf.mxu0  ;;  %v327_v40 = vpop.f32.mrf.mxu1 }
  0xe5   :  { %v198_v41 = vadd.f32 %v223_v37, %v188_v38 }
  0xe7   :  { %199 = vrot.lane.b32.xlu0 %v198_v41, %s338_s1 }
 0x159   :  { %v200_v42 = vpop.permute.xlu0 %199 }
 0x15a   :  { %v201_v43 = vmax.f32 %v198_v41, %v200_v42 }
 0x15c   :  { %202 = vrot.lane.b32.xlu0 %v201_v43, %s339_s29 }
 0x1ce   :  { %v203_v44 = vpop.permute.xlu0 %202 }
 0x1cf   :  { %v204_v45 = vmax.f32 %v201_v43, %v203_v44 }
 0x1d1   :  { %v205_v46 = vsub.f32 %v198_v41, %v204_v45 }
 0x1d3   :  { %v206_v47 = vmul.f32 1.442695, %v205_v46 }
 0x1d5   :  { %332 = vpow2.f32 %v206_v47 }
 0x1e2   :  { %v333_v48 = vpop.eup %332 }
 0x1e3   :  { %208 = vrot.lane.b32.xlu1 %v333_v48, %s338_s1 }
 0x255   :  { %v209_v49 = vpop.permute.xlu1 %208 }
 0x256   :  { %v210_v50 = vadd.f32 %v333_v48, %v209_v49 }
 0x258   :  { %211 = vrot.lane.b32.xlu1 %v210_v50, %s339_s29 }
 0x2ca   :  { %v212_v51 = vpop.permute.xlu1 %211 }
 0x2cb   :  { %v213_v52 = vadd.f32 %v212_v51, %v210_v50 }
 0x2cd   :  { %334 = vlog2.f32 %v213_v52 }
 0x2da   :  { %v335_v53 = vpop.eup %334 }
 0x2db   :  { %v215_v54 = vmul.f32 0.6931472, %v335_v53 }
 0x2dd   :  { %v216_v55 = vadd.f32 %v215_v54, %v204_v45 }
 0x2df   :  { %218 = vst.msk [vmem:[%s508_s4] sm:$0xff] %vm217_vm1, %v216_v55 }

</bundles_post_ra>
